<compile_context>
chip_gen: v5e
topology: v5e:2x2
jax: 0.10.0
libtpu: 0.0.40
codegen_flags: <defaults>
</compile_context>

<pallas_src>
import functools

import jax
import jax.numpy as jnp
from jax.experimental import pallas as pl
from jax.experimental.pallas import tpu as pltpu


def _round_up(x: int, m: int) -> int:
    return (x + m - 1) // m * m


def toy_mlp_kernel(x_ref, w1_ref, b1_ref, w2_ref, b2_ref, o_ref):
    # in_proj on the MXU: (TILE_B, K) @ (K, H) with f32 accumulation.
    h = jnp.dot(x_ref[...], w1_ref[...], preferred_element_type=jnp.float32)
    # Bias + ReLU in f32 on the VPU (v5e-safe: no bf16 VPU path needed).
    h = jnp.maximum(h + b1_ref[...], 0.0)
    # out_proj on the MXU.
    o = jnp.dot(h, w2_ref[...], preferred_element_type=jnp.float32)
    o_ref[...] = (o + b2_ref[...]).astype(o_ref.dtype)


@functools.partial(jax.jit, static_argnames=("tile_b",))
def toy_model_forward(x, w1, b1, w2, b2, *, tile_b: int = 1024):
    """Fused ToyModel forward.

    x : (B, in_features)               float32
    w1: (in_features, 2*in_features)   (pre-transposed vs. PyTorch)
    b1: (2*in_features,)
    w2: (2*in_features, out_features)  (pre-transposed vs. PyTorch)
    b2: (out_features,)
    returns (B, out_features) in x.dtype
    """
    B, K = x.shape
    K2, H = w1.shape
    H2, N = w2.shape
    assert K == K2 and H == H2 and b1.shape == (H,) and b2.shape == (N,)

    # Batch tile: sublane-aligned (multiple of 8), clamped to the batch.
    TILE_B = _round_up(min(tile_b, B), 8)
    # If one tile would cover a large batch, split it so the batch grid has
    # >=2 steps -- lets "parallel" shard work across both TensorCores on v7x
    # (no-op on v5e/v6e).
    if TILE_B >= B and B >= 256:
        TILE_B = _round_up(pl.cdiv(B, 2), 8)
    grid = (pl.cdiv(B, TILE_B),)

    # Biases as (1, F) rows so they get a lane-dense VMEM block.
    b1_2d = b1.reshape(1, H)
    b2_2d = b2.reshape(1, N)

    itemsize = jnp.dtype(x.dtype).itemsize
    cost = pl.CostEstimate(
        flops=2 * B * K * H + 2 * B * H * N,
        transcendentals=0,
        bytes_accessed=(x.size + w1.size + b1.size + w2.size + b2.size) * itemsize
        + B * N * itemsize,
    )

    return pl.pallas_call(
        toy_mlp_kernel,
        out_shape=jax.ShapeDtypeStruct((B, N), x.dtype),
        grid=grid,
        in_specs=[
            # x: one batch tile per grid step (double-buffered by Pallas).
            # K equals the full array dim -> (8,128) rule satisfied unpadded.
            pl.BlockSpec((TILE_B, K), lambda i: (i, 0)),
            # Weights / biases: resident, same block every step (no re-DMA).
            pl.BlockSpec((K, H), lambda i: (0, 0)),
            pl.BlockSpec((1, H), lambda i: (0, 0)),
            pl.BlockSpec((H, N), lambda i: (0, 0)),
            pl.BlockSpec((1, N), lambda i: (0, 0)),
        ],
        # Unpadded output tile; N equals the full array dim (legal block).
        out_specs=pl.BlockSpec((TILE_B, N), lambda i: (i, 0)),
        compiler_params=pltpu.CompilerParams(
            dimension_semantics=("parallel",),  # 2 TCs on v7x; no-op v5e/v6e
        ),
        cost_estimate=cost,
    )(x, w1, b1_2d, w2, b2_2d)


def init_params(key, in_features, out_features, dtype=jnp.float32):
    """Deterministic init mimicking nn.Linear's uniform(-1/sqrt(fan_in), +)."""
    hidden = 2 * in_features
    k1, k2, k3, k4 = jax.random.split(key, 4)
    bound1 = 1.0 / (in_features ** 0.5)
    bound2 = 1.0 / (hidden ** 0.5)
    # Stored already transposed relative to PyTorch's (out, in) layout.
    w1 = jax.random.uniform(k1, (in_features, hidden), dtype, -bound1, bound1)
    b1 = jax.random.uniform(k2, (hidden,), dtype, -bound1, bound1)
    w2 = jax.random.uniform(k3, (hidden, out_features), dtype, -bound2, bound2)
    b2 = jax.random.uniform(k4, (out_features,), dtype, -bound2, bound2)
    return w1, b1, w2, b2


if __name__ == "__main__":
    key = jax.random.PRNGKey(0)
    kx, kp, kx2 = jax.random.split(key, 3)

    # Small shapes implied by the module.
    batch = 8
    in_features = 32
    out_features = 16

    x = jax.random.normal(kx, (batch, in_features), jnp.float32)
    w1, b1, w2, b2 = init_params(kp, in_features, out_features)

    out = toy_model_forward(x, w1, b1, w2, b2)
    jax.block_until_ready(out)

    # Pure-JAX reference (same math as the PyTorch module).  Both paths use
    # TPU default matmul precision; tolerance covers accumulation-order noise.
    ref = jnp.maximum(x @ w1 + b1, 0.0) @ w2 + b2
    assert out.shape == (batch, out_features)
    assert jnp.allclose(out, ref, atol=2e-2, rtol=2e-2), "mismatch (small batch)"

    # Exercise the multi-step grid with a ragged last block (200 = 3*64 + 8).
    batch2 = 200
    x2 = jax.random.normal(kx2, (batch2, in_features), jnp.float32)
    out2 = toy_model_forward(x2, w1, b1, w2, b2, tile_b=64)
    jax.block_until_ready(out2)
    ref2 = jnp.maximum(x2 @ w1 + b1, 0.0) @ w2 + b2
    assert out2.shape == (batch2, out_features)
    assert jnp.allclose(out2, ref2, atol=2e-2, rtol=2e-2), "mismatch (ragged grid)"

    print("KERNEL_OK")
</pallas_src>

<mosaic_0001>
module attributes {stable_mosaic.version = 11 : i64} {
  func.func @toy_mlp_kernel(%arg0: i32, %arg1: memref<8x32xf32, #tpu.memory_space<vmem>>, %arg2: memref<32x64xf32, #tpu.memory_space<vmem>>, %arg3: memref<1x64xf32, #tpu.memory_space<vmem>>, %arg4: memref<64x16xf32, #tpu.memory_space<vmem>>, %arg5: memref<1x16xf32, #tpu.memory_space<vmem>>, %arg6: memref<8x16xf32, #tpu.memory_space<vmem>>) attributes {dimension_semantics = [#tpu.dimension_semantics<parallel>], iteration_bounds = array<i64: 1>, scalar_prefetch = 0 : i64, scratch_operands = 0 : i64, tpu.core_type = #tpu.core_type<tc>, window_params = [{transform_indices = @transform_0, window_bounds = array<i64: 8, 32>}, {pipeline_mode = #tpu.pipeline_mode<synchronous>, transform_indices = @transform_1, window_bounds = array<i64: 32, 64>}, {pipeline_mode = #tpu.pipeline_mode<synchronous>, transform_indices = @transform_2, window_bounds = array<i64: 1, 64>}, {pipeline_mode = #tpu.pipeline_mode<synchronous>, transform_indices = @transform_3, window_bounds = array<i64: 64, 16>}, {pipeline_mode = #tpu.pipeline_mode<synchronous>, transform_indices = @transform_4, window_bounds = array<i64: 1, 16>}, {transform_indices = @transform_5, window_bounds = array<i64: 8, 16>}]} {
    %c0 = arith.constant 0 : index
    %c0_0 = arith.constant 0 : index
    %0 = vector.load %arg1[%c0, %c0_0] : memref<8x32xf32, #tpu.memory_space<vmem>>, vector<8x32xf32>
    %c0_1 = arith.constant 0 : index
    %c0_2 = arith.constant 0 : index
    %1 = vector.load %arg2[%c0_1, %c0_2] : memref<32x64xf32, #tpu.memory_space<vmem>>, vector<32x64xf32>
    %cst = arith.constant dense<0.000000e+00> : vector<8x64xf32>
    %2 = tpu.matmul %0, %1, %cst {dimension_numbers = #tpu.dot_dimension_numbers<[1], [0], [0], [1], [0, 0, 1, 1], [], []>} : vector<8x32xf32>, vector<32x64xf32>, vector<8x64xf32> -> vector<8x64xf32>
    %c0_3 = arith.constant 0 : index
    %c0_4 = arith.constant 0 : index
    %3 = vector.load %arg3[%c0_3, %c0_4] : memref<1x64xf32, #tpu.memory_space<vmem>>, vector<1x64xf32>
    %4 = vector.broadcast %3 : vector<1x64xf32> to vector<8x64xf32>
    %5 = arith.addf %2, %4 : vector<8x64xf32>
    %cst_5 = arith.constant 0.000000e+00 : f32
    %6 = vector.broadcast %cst_5 : f32 to vector<8x64xf32>
    %7 = arith.maximumf %5, %6 : vector<8x64xf32>
    %c0_6 = arith.constant 0 : index
    %c0_7 = arith.constant 0 : index
    %8 = vector.load %arg4[%c0_6, %c0_7] : memref<64x16xf32, #tpu.memory_space<vmem>>, vector<64x16xf32>
    %cst_8 = arith.constant dense<0.000000e+00> : vector<8x16xf32>
    %9 = tpu.matmul %7, %8, %cst_8 {dimension_numbers = #tpu.dot_dimension_numbers<[1], [0], [0], [1], [0, 0, 1, 1], [], []>} : vector<8x64xf32>, vector<64x16xf32>, vector<8x16xf32> -> vector<8x16xf32>
    %c0_9 = arith.constant 0 : index
    %c0_10 = arith.constant 0 : index
    %10 = vector.load %arg5[%c0_9, %c0_10] : memref<1x16xf32, #tpu.memory_space<vmem>>, vector<1x16xf32>
    %11 = vector.broadcast %10 : vector<1x16xf32> to vector<8x16xf32>
    %12 = arith.addf %9, %11 : vector<8x16xf32>
    %c0_11 = arith.constant 0 : index
    %c0_12 = arith.constant 0 : index
    %13 = vector.load %arg6[%c0_11, %c0_12] : memref<8x16xf32, #tpu.memory_space<vmem>>, vector<8x16xf32>
    tpu.vector_store %arg6[%c0_11, %c0_12], %12 {strides = array<i32>} : memref<8x16xf32, #tpu.memory_space<vmem>>, vector<8x16xf32>,
    return
  }
  func.func @transform_0(%arg0: i32) -> (i32, i32) {
    %c0_i32 = arith.constant 0 : i32
    %c0_i32_0 = arith.constant 0 : i32
    return %arg0, %c0_i32 : i32, i32
  }
  func.func @transform_1(%arg0: i32) -> (i32, i32) {
    %c0_i32 = arith.constant 0 : i32
    %c0_i32_0 = arith.constant 0 : i32
    %c0_i32_1 = arith.constant 0 : i32
    return %c0_i32, %c0_i32_0 : i32, i32
  }
  func.func @transform_2(%arg0: i32) -> (i32, i32) {
    %c0_i32 = arith.constant 0 : i32
    %c0_i32_0 = arith.constant 0 : i32
    %c0_i32_1 = arith.constant 0 : i32
    return %c0_i32, %c0_i32_0 : i32, i32
  }
  func.func @transform_3(%arg0: i32) -> (i32, i32) {
    %c0_i32 = arith.constant 0 : i32
    %c0_i32_0 = arith.constant 0 : i32
    %c0_i32_1 = arith.constant 0 : i32
    return %c0_i32, %c0_i32_0 : i32, i32
  }
  func.func @transform_4(%arg0: i32) -> (i32, i32) {
    %c0_i32 = arith.constant 0 : i32
    %c0_i32_0 = arith.constant 0 : i32
    %c0_i32_1 = arith.constant 0 : i32
    return %c0_i32, %c0_i32_0 : i32, i32
  }
  func.func @transform_5(%arg0: i32) -> (i32, i32) {
    %c0_i32 = arith.constant 0 : i32
    %c0_i32_0 = arith.constant 0 : i32
    return %arg0, %c0_i32 : i32, i32
  }
}

</mosaic_0001>

<bundles_post_ra>
// kernel: toy_model_forward.1
= control target key start
LH: loop header
LB: loop body
LE: loop exit
PB: predicated region body
PF: predicated region fallthrough
CT: control target
= control target key end

     0   :  { %s219_s0 = inlined_call_operand.vmem [shape: f32[8,32], index: 0, kind: input, shape index: {}]   ;;  %s220_s1 = inlined_call_operand.vmem [shape: f32[32,64], index: 1, kind: input, shape index: {}]   ;;  %s221_s2 = inlined_call_operand.vmem [shape: f32[1,64], index: 2, kind: input, shape index: {}]   ;;  %s222_s3 = inlined_call_operand.vmem [shape: f32[64,16], index: 3, kind: input, shape index: {}]   ;;  %s223_s4 = inlined_call_operand.vmem [shape: f32[1,16], index: 4, kind: input, shape index: {}]   ;;  %s224_s5 = inlined_call_operand.hbm [shape: f32[8,16], index: 5, kind: output, shape index: {}]  }
   0x1   :  { %v25_v0 = vld [vmem:[%s220_s1 + $0x18] sm:$0xff]  ;;  %v24_v1 = vld [vmem:[%s220_s1 + $0x10] sm:$0xff]  ;;  %v23_v3 = vld [vmem:[%s220_s1 + $0x8] sm:$0xff] }
   0x2   :  { %46 = vmatpush.msra.mxu0 %v25_v0  ;;  %v62_v2 = vld [vmem:[%s222_s3 + $0x38] sm:$0xff]  ;;  %v61_v4 = vld [vmem:[%s222_s3 + $0x30] sm:$0xff]  ;;  %v60_v5 = vld [vmem:[%s222_s3 + $0x28] sm:$0xff] }
   0x3   :  { %79 = vmatpush.msra.mxu1 %v62_v2  ;;  %v22_v6 = vld [vmem:[%s220_s1] sm:$0xff] }
   0x4   :  { %47 = vmatpush.msra.mxu0 %v24_v1 }
   0x5   :  { %80 = vmatpush.msra.mxu1 %v61_v4 }
   0x6   :  { %10 = vsyncpa [#allocation3], 0  ;;  %48 = vmatpush.msra.mxu0 %v23_v3  ;;  %v21_v7 = vld [vmem:[%s219_s0] sm:$0xff]  ;;  %vm30_vm0 = vcmask 261120   ;;  %v58_v9 = vld [vmem:[%s222_s3 + $0x18] sm:$0xff]  ;;  %vm67_vm1 = vcmask 523264  }
   0x7   :  { %v59_v8 = vld [vmem:[%s222_s3 + $0x20] sm:$0xff]  ;;  %81 = vmatpush.msra.mxu1 %v60_v5  ;;  %v57_v10 = vld [vmem:[%s222_s3 + $0x10] sm:$0xff]  ;;  %v56_v11 = vld [vmem:[%s222_s3 + $0x8] sm:$0xff]  ;;  %s140_s21 = smov [#allocation2]   ;;  %vm91_vm2 = vcmask 130048  }
   0x8   :  { %49 = vmatpush.msra.mxu0 %v22_v6  ;;  %v55_v12 = vld [vmem:[%s222_s3] sm:$0xff]  ;;  %s98_s22 = sshll.u32 %s140_s21, 4  ;;  %s100_s3 = sshll.u32 %s224_s5, 4  ;;  %s99_s22 = int_to_ptr.vmem [resolvable:$true] %s98_s22  ;;  %s101_s3 = int_to_ptr.hbm [resolvable:$true] %s100_s3 }
   0x9   :  { %109 = vmatmul.msk.f32.vlgmr.msra.gmra.mxu0 %vm30_vm0, %v21_v7  ;;  %82 = vmatpush.msra.mxu1 %v59_v8  ;;  %v112_v13 = vld [vmem:[%s221_s2] ss:$0 sm:$0xff] }
   0xa   :  { %v113_v17 = vld [vmem:[%s223_s4] ss:$0 sm:$0xff] }
   0xb   :  { %83 = vmatpush.msra.mxu1 %v58_v9 }
   0xd   :  { %84 = vmatpush.msra.mxu1 %v57_v10 }
   0xf   :  { %85 = vmatpush.msra.mxu1 %v56_v11 }
  0x11   :  { %86 = vmatpush.msra.mxu1 %v55_v12 }
  0x86   :  { %v51_v14 = vpop.f32.mrf.mxu0 }
  0x87   :  { %v52_v15 = vadd.f32 %v112_v13, %v51_v14 }
  0x89   :  { %v54_v16 = vmax.f32 %v52_v15, 0.0 }
  0x8b   :  { %110 = vmatmul.msk.f32.vlgmr.msra.gmra.mxu1 %vm67_vm1, %v54_v16 }
 0x108   :  { %v88_v18 = vpop.f32.mrf.mxu1 }
 0x109   :  { %v89_v19 = vadd.f32 %v113_v17, %v88_v18 }
 0x10b   :  { %92 = vst.msk [vmem:[#allocation2] sm:$0xff] %vm91_vm2, %v89_v19 }
 0x10c   :  { %103 = dma.vmem_to_hbm [thread:$0]  %s99_s22, 128, %s101_s3, [#allocation3]  }
 0x10d   :  { %138 = dma.done.wait [#allocation3], 128  }
 0x10e   :  { %139 = vsyncadd [#allocation3], 4294967168 }
 0x10f   :  { %108 = vsyncpa [#allocation3], 1 }

</bundles_post_ra>
